<compile_context>
chip_gen: v5e
topology: v5e:2x2
jax: 0.10.0
libtpu: 0.0.40
codegen_flags: <defaults>
</compile_context>

<pallas_src>
import jax
import jax.numpy as jnp
from jax.experimental import pallas as pl
from jax.experimental.pallas import tpu as pltpu


def opseq_kernel(x_ref, w1_ref, b1_ref, w2_ref, b2_ref, o_ref):
    # x_ref:  (Cin,  TS)   lane-dense spatial tile of one batch element
    # w1_ref: (Cmid, Cin)  first 1x1-conv weight (PyTorch (Cout, Cin) layout, no transpose)
    # b1_ref: (Cmid, 1)    first bias, broadcasts along the lane (spatial) axis
    # w2_ref: (Cout, Cmid) second 1x1-conv weight
    # b2_ref: (Cout, 1)    second bias
    # o_ref:  (Cout, TS)
    x = x_ref[...]
    h = jnp.dot(w1_ref[...], x, preferred_element_type=jnp.float32) + b1_ref[...]
    h = jnp.maximum(h, 0.0)  # ReLU (VPU; free next to the MXU work)
    y = jnp.dot(w2_ref[...], h, preferred_element_type=jnp.float32) + b2_ref[...]
    o_ref[...] = y.astype(o_ref.dtype)


def _pick_spatial_tile(hw: int, max_tile: int = 2048) -> int:
    """Largest lane-friendly tile of the H*W axis (divides hw; multiple of 128 when possible)."""
    if hw <= max_tile:
        return hw                      # block == full dim is always legal
    if hw % 128 == 0:
        ts = max_tile - (max_tile % 128)
        while hw % ts != 0:
            ts -= 128
        return ts
    return hw                          # fallback: full spatial extent


def op_sequential_forward(x_nchw, w1, b1, w2, b2, *, max_spatial_tile=2048):
    """OpSequential([Conv1x1, ReLU, Conv1x1]) forward.

    x_nchw: (N, Cin, H, W)
    w1: (Cmid, Cin), b1: (Cmid,)   (PyTorch Conv2d 1x1 weight (Cout,Cin,1,1) squeezed)
    w2: (Cout, Cmid), b2: (Cout,)
    """
    N, Cin, H, W = x_nchw.shape
    Cmid = w1.shape[0]
    Cout = w2.shape[0]
    HW = H * W

    # NCHW -> (N, C, H*W): pure reshape, no transpose / copy.
    x3 = x_nchw.reshape(N, Cin, HW)

    # Biases as (C, 1) columns so they broadcast along the lane (spatial) axis.
    w1f = w1.astype(jnp.float32)
    w2f = w2.astype(jnp.float32)
    b1c = b1.reshape(Cmid, 1).astype(jnp.float32)
    b2c = b2.reshape(Cout, 1).astype(jnp.float32)

    ts = _pick_spatial_tile(HW, max_spatial_tile)
    grid = (N, HW // ts)

    # Advisory cost for XLA scheduling around the call.
    itemsize = x3.dtype.itemsize
    cost = pl.CostEstimate(
        flops=2 * N * HW * (Cin * Cmid + Cmid * Cout),
        transcendentals=0,
        bytes_accessed=(x3.size * itemsize
                        + (w1f.size + w2f.size + b1c.size + b2c.size) * 4
                        + N * Cout * HW * itemsize),
    )

    out3 = pl.pallas_call(
        opseq_kernel,
        out_shape=jax.ShapeDtypeStruct((N, Cout, HW), x3.dtype),
        grid=grid,
        in_specs=[
            pl.BlockSpec((None, Cin, ts), lambda n, s: (n, 0, s)),  # x tile (batch dim squeezed)
            pl.BlockSpec((Cmid, Cin), lambda n, s: (0, 0)),         # conv1 weight (resident)
            pl.BlockSpec((Cmid, 1), lambda n, s: (0, 0)),           # conv1 bias
            pl.BlockSpec((Cout, Cmid), lambda n, s: (0, 0)),        # conv2 weight (resident)
            pl.BlockSpec((Cout, 1), lambda n, s: (0, 0)),           # conv2 bias
        ],
        out_specs=pl.BlockSpec((None, Cout, ts), lambda n, s: (n, 0, s)),
        compiler_params=pltpu.CompilerParams(
            dimension_semantics=("parallel", "parallel"),
            vmem_limit_bytes=32 * 1024 * 1024,
        ),
        cost_estimate=cost,
    )(x3, w1f, b1c, w2f, b2c)

    # (N, Cout, H*W) -> NCHW: free reshape.
    return out3.reshape(N, Cout, H, W)


if __name__ == "__main__":
    key = jax.random.PRNGKey(0)
    k_x, k_w1, k_b1, k_w2, k_b2 = jax.random.split(key, 5)

    N, C, H, W = 2, 4, 16, 16
    x = jax.random.normal(k_x, (N, C, H, W), dtype=jnp.float32)

    # PyTorch Conv2d 1x1 weights: (Cout, Cin, 1, 1) -> (Cout, Cin).
    w1 = jax.random.normal(k_w1, (C, C), dtype=jnp.float32) * 0.1
    b1 = jax.random.normal(k_b1, (C,), dtype=jnp.float32) * 0.1
    w2 = jax.random.normal(k_w2, (C, C), dtype=jnp.float32) * 0.1
    b2 = jax.random.normal(k_b2, (C,), dtype=jnp.float32) * 0.1

    out = op_sequential_forward(x, w1, b1, w2, b2)
    out = jax.block_until_ready(out)

    # Pure-JAX reference of OpSequential([Conv1x1, ReLU, None, Conv1x1]).
    h_ref = jnp.einsum("oc,nchw->nohw", w1, x) + b1[None, :, None, None]
    h_ref = jnp.maximum(h_ref, 0.0)
    y_ref = jnp.einsum("oc,nchw->nohw", w2, h_ref) + b2[None, :, None, None]

    assert out.shape == (N, C, H, W)
    assert jnp.allclose(out, y_ref, atol=1e-4, rtol=1e-4)

    print("KERNEL_OK")
</pallas_src>

<mosaic_0001>
module attributes {stable_mosaic.version = 11 : i64} {
  func.func @opseq_kernel(%arg0: i32, %arg1: i32, %arg2: memref<1x4x256xf32, #tpu.memory_space<vmem>>, %arg3: memref<4x4xf32, #tpu.memory_space<vmem>>, %arg4: memref<4x1xf32, #tpu.memory_space<vmem>>, %arg5: memref<4x4xf32, #tpu.memory_space<vmem>>, %arg6: memref<4x1xf32, #tpu.memory_space<vmem>>, %arg7: memref<1x4x256xf32, #tpu.memory_space<vmem>>) attributes {dimension_semantics = [#tpu.dimension_semantics<parallel>, #tpu.dimension_semantics<parallel>], iteration_bounds = array<i64: 2, 1>, scalar_prefetch = 0 : i64, scratch_operands = 0 : i64, tpu.core_type = #tpu.core_type<tc>, window_params = [{transform_indices = @transform_0, window_bounds = array<i64: 1, 4, 256>}, {pipeline_mode = #tpu.pipeline_mode<synchronous>, transform_indices = @transform_1, window_bounds = array<i64: 4, 4>}, {pipeline_mode = #tpu.pipeline_mode<synchronous>, transform_indices = @transform_2, window_bounds = array<i64: 4, 1>}, {pipeline_mode = #tpu.pipeline_mode<synchronous>, transform_indices = @transform_3, window_bounds = array<i64: 4, 4>}, {pipeline_mode = #tpu.pipeline_mode<synchronous>, transform_indices = @transform_4, window_bounds = array<i64: 4, 1>}, {transform_indices = @transform_5, window_bounds = array<i64: 1, 4, 256>}]} {
    %c0 = arith.constant 0 : index
    %c0_0 = arith.constant 0 : index
    %c0_1 = arith.constant 0 : index
    %0 = vector.load %arg2[%c0, %c0_0, %c0_1] : memref<1x4x256xf32, #tpu.memory_space<vmem>>, vector<1x4x256xf32>
    %1 = vector.shape_cast %0 : vector<1x4x256xf32> to vector<4x256xf32>
    %c0_2 = arith.constant 0 : index
    %c0_3 = arith.constant 0 : index
    %2 = vector.load %arg3[%c0_2, %c0_3] : memref<4x4xf32, #tpu.memory_space<vmem>>, vector<4x4xf32>
    %cst = arith.constant dense<0.000000e+00> : vector<4x256xf32>
    %3 = tpu.matmul %2, %1, %cst {dimension_numbers = #tpu.dot_dimension_numbers<[1], [0], [0], [1], [0, 0, 1, 1], [], []>} : vector<4x4xf32>, vector<4x256xf32>, vector<4x256xf32> -> vector<4x256xf32>
    %c0_4 = arith.constant 0 : index
    %c0_5 = arith.constant 0 : index
    %4 = vector.load %arg4[%c0_4, %c0_5] : memref<4x1xf32, #tpu.memory_space<vmem>>, vector<4x1xf32>
    %5 = vector.broadcast %4 : vector<4x1xf32> to vector<4x256xf32>
    %6 = arith.addf %3, %5 : vector<4x256xf32>
    %cst_6 = arith.constant 0.000000e+00 : f32
    %7 = vector.broadcast %cst_6 : f32 to vector<4x256xf32>
    %8 = arith.maximumf %6, %7 : vector<4x256xf32>
    %c0_7 = arith.constant 0 : index
    %c0_8 = arith.constant 0 : index
    %9 = vector.load %arg5[%c0_7, %c0_8] : memref<4x4xf32, #tpu.memory_space<vmem>>, vector<4x4xf32>
    %cst_9 = arith.constant dense<0.000000e+00> : vector<4x256xf32>
    %10 = tpu.matmul %9, %8, %cst_9 {dimension_numbers = #tpu.dot_dimension_numbers<[1], [0], [0], [1], [0, 0, 1, 1], [], []>} : vector<4x4xf32>, vector<4x256xf32>, vector<4x256xf32> -> vector<4x256xf32>
    %c0_10 = arith.constant 0 : index
    %c0_11 = arith.constant 0 : index
    %11 = vector.load %arg6[%c0_10, %c0_11] : memref<4x1xf32, #tpu.memory_space<vmem>>, vector<4x1xf32>
    %12 = vector.broadcast %11 : vector<4x1xf32> to vector<4x256xf32>
    %13 = arith.addf %10, %12 : vector<4x256xf32>
    %c0_12 = arith.constant 0 : index
    %c0_13 = arith.constant 0 : index
    %c0_14 = arith.constant 0 : index
    %14 = vector.load %arg7[%c0_12, %c0_13, %c0_14] : memref<1x4x256xf32, #tpu.memory_space<vmem>>, vector<1x4x256xf32>
    %15 = vector.shape_cast %14 : vector<1x4x256xf32> to vector<4x256xf32>
    %16 = vector.shape_cast %13 : vector<4x256xf32> to vector<1x4x256xf32>
    tpu.vector_store %arg7[%c0_12, %c0_13, %c0_14], %16 {strides = array<i32>} : memref<1x4x256xf32, #tpu.memory_space<vmem>>, vector<1x4x256xf32>,
    return
  }
  func.func @transform_0(%arg0: i32, %arg1: i32) -> (i32, i32, i32) {
    %c0_i32 = arith.constant 0 : i32
    %c0_i32_0 = arith.constant 0 : i32
    return %arg0, %c0_i32, %arg1 : i32, i32, i32
  }
  func.func @transform_1(%arg0: i32, %arg1: i32) -> (i32, i32) {
    %c0_i32 = arith.constant 0 : i32
    %c0_i32_0 = arith.constant 0 : i32
    %c0_i32_1 = arith.constant 0 : i32
    return %c0_i32, %c0_i32_0 : i32, i32
  }
  func.func @transform_2(%arg0: i32, %arg1: i32) -> (i32, i32) {
    %c0_i32 = arith.constant 0 : i32
    %c0_i32_0 = arith.constant 0 : i32
    %c0_i32_1 = arith.constant 0 : i32
    return %c0_i32, %c0_i32_0 : i32, i32
  }
  func.func @transform_3(%arg0: i32, %arg1: i32) -> (i32, i32) {
    %c0_i32 = arith.constant 0 : i32
    %c0_i32_0 = arith.constant 0 : i32
    %c0_i32_1 = arith.constant 0 : i32
    return %c0_i32, %c0_i32_0 : i32, i32
  }
  func.func @transform_4(%arg0: i32, %arg1: i32) -> (i32, i32) {
    %c0_i32 = arith.constant 0 : i32
    %c0_i32_0 = arith.constant 0 : i32
    %c0_i32_1 = arith.constant 0 : i32
    return %c0_i32, %c0_i32_0 : i32, i32
  }
  func.func @transform_5(%arg0: i32, %arg1: i32) -> (i32, i32, i32) {
    %c0_i32 = arith.constant 0 : i32
    %c0_i32_0 = arith.constant 0 : i32
    return %arg0, %c0_i32, %arg1 : i32, i32, i32
  }
}

</mosaic_0001>

<bundles_post_ra>
// kernel: tpu_custom_call.1
= control target key start
LH: loop header
LB: loop body
LE: loop exit
PB: predicated region body
PF: predicated region fallthrough
CT: control target
= control target key end

     0   :  { %10 = vsyncpa [#allocation3], 0  ;;  %s870_s0 = inlined_call_operand.hbm [shape: f32[2,4,256], index: 0, kind: input, shape index: {}]   ;;  %s871_s1 = inlined_call_operand.vmem [shape: f32[4,4], index: 1, kind: input, shape index: {}]   ;;  %s872_s2 = inlined_call_operand.vmem [shape: f32[4,1], index: 2, kind: input, shape index: {}]   ;;  %s873_s3 = inlined_call_operand.vmem [shape: f32[4,4], index: 3, kind: input, shape index: {}]   ;;  %s874_s4 = inlined_call_operand.vmem [shape: f32[4,1], index: 4, kind: input, shape index: {}]   ;;  %s875_s5 = inlined_call_operand.hbm [shape: f32[2,4,256], index: 5, kind: output, shape index: {}]  }
   0x1   :  { %12 = vsyncpa [#allocation3 + $0x1], 0 }
   0x2   :  { %13 = vsyncpa [#allocation4], 0 }
   0x3   :  { %15 = vsyncpa [#allocation4 + $0x1], 0  ;;  %s725_s18 = smov 0   ;;  %s727_s19 = smov 0  }
   0x4   :  { %s729_s20 = smov 0   ;;  %s731_s21 = smov 0  }
   0x5   :  { %s733_s22 = smov 0   ;;  %s735_s23 = smov 0  }
   0x6 LB: > { %s491_s24 = sadd.s32 4294967295, %s692_s23   ;;  %s492_s25 = sadd.s32 4294967294, %s692_s23   ;;  %s692_s23 = sphi %s735_s23, %s21_s23   ;;  %s688_s22 = sphi %s733_s22, %s884_s22   ;;  %s684_s21 = sphi %s731_s21, %s883_s21   ;;  %s680_s20 = sphi %s729_s20, %s882_s20   ;;  %s676_s19 = sphi %s727_s19, %s881_s19   ;;  %s672_s18 = sphi %s725_s18, %s880_s18  }
   0x7   : > { %s33_s26 = sadd.s32 1, %s688_s22  ;;  %s42_s27 = sadd.s32 1, %s680_s20 }
   0x8   : > { %p35_p0 = scmp.ge.s32.totalorder %s33_s26, 2  ;;  %p49_p1 = scmp.ne.s32.totalorder %s680_s20, %s676_s19 }
   0x9   : > { %p50_p2 = scmp.eq.s32.totalorder %s692_s23, 0  ;;  %p55_p3 = scmp.ne.s32.totalorder %s676_s19, %s672_s18 }
   0xa   : > { %s886_s26 = smov (%p35_p0, %s33_s26), 0  ;;  %p56_p5 = scmp.eq.s32.totalorder %s491_s24, 0 }
   0xb   : > { %p766_p4 = por %p50_p2, %p49_p1  ;;  %s37_s29 = ssub.s32 %s688_s22, %s886_s26 }
   0xc   : > { %p165_p6 = scmp.eq.s32.totalorder %s491_s24, 1  ;;  %p40_p7 = scmp.eq.s32.totalorder %s37_s29, 0 }
   0xd   : > { %p772_p8 = por %p56_p5, %p55_p3  ;;  %p171_p10 = scmp.eq.s32.totalorder %s492_s25, 1 }
   0xe   : > { %p776_p9 = por %p165_p6, %p49_p1  ;;  %p494_p12 = scmp.ge.s32.totalorder %s692_s23, 2 }
   0xf   : > { %s781_s7 = scalar_select %p40_p7, %s680_s20, %s42_s27  }
  0x10   : > { %p783_p11 = por %p171_p10, %p55_p3  ;;  %p528_p13 = scmp.lt.s32.totalorder %s692_s23, 2 }
  0x11   : > { %s203_s9 = sand.u32 1, %s680_s20   ;;  %s514_s11 = sshll.u32 %s688_s22, 3 }
  0x12   : > { %s495_s10 = sshll.u32 %s203_s9, 3  ;;  %s214_s14 = scalar_lea.hbm %s870_s0, %s514_s11 }
  0x13   : > { %s207_s15 = scalar_lea.vmem [#allocation2], %s495_s10  ;;  %s216_s17 = sshll.u32 %s214_s14, 4  ;;  %s217_s17 = int_to_ptr.hbm [resolvable:$true] %s216_s17 }
  0x14   : > { %s218_s16 = sshll.u32 %s207_s15, 4  ;;  %p521_p0 = pnand %p528_p13, %p766_p4  ;;  %s219_s16 = int_to_ptr.vmem [resolvable:$true] %s218_s16 }
  0x15   : > { %p498_p1 = scmp.ge.s32.totalorder %s692_s23, 1  ;;  %p223_p2 = scmp.lt.s32.totalorder %s692_s23, 3 }
  0x16   : > { %s204_s24 = scalar_lea.sflag [#allocation3], %s203_s9 }
  0x17   : > { %523 = dma.hbm_to_vmem [thread:$0]  (!%p521_p0), %s217_s17, 128, %s219_s16, %s204_s24  }
  0x18   : > { %p224_p3 = pnand %p498_p1, %p223_p2 }
  0x19   : > { %s799_s25 = sand.u32 (!%p224_p3), 1, %s676_s19  }
  0x1a   : > { %227 = sbr.rel (%p224_p3) target bundleno = 313 (0x139), region = 40  ;;  %s499_s27 = sshll.u32 (!%p224_p3), %s799_s25, 3 }
  0x1b   : > { %s230_s29 = scalar_lea.sflag (!%p224_p3), [#allocation3], %s799_s25  ;;  %s233_s10 = scalar_lea.vmem (!%p224_p3), [#allocation2], %s499_s27 }
  0x1f   : > { %663 = dma.done.wait (%p772_p8), %s230_s29, 128  }
  0x20   : > { %665 = vsyncadd (%p772_p8), %s230_s29, 4294967168  ;;  %v694_v0 = vmov 0   ;;  %v263_v1 = vld [vmem:[%s233_s10] sm:$0xff]  ;;  %v265_v2 = vld [vmem:[%s872_s2] sm:$0xf]  ;;  %vm279_vm0 = vcmask 1043456  }
  0x21   : > { %579 = vset.pattern.permute.xlu0 %v694_v0  ;;  %272 = vst [vmem:[#allocation1] ss:$2 sm:$0xff] %v263_v1  ;;  %v264_v3 = vld [vmem:[%s871_s1] sm:$0xf]  ;;  %vm275_vm1 = vcmask 31744   ;;  %s515_s16 = sshll.u32 %s684_s21, 3 }
  0x22   : > { %268 = vperm.xlu0 %579, %v265_v2   ;;  %v327_v4 = vld [vmem:[%s874_s4] sm:$0xf]  ;;  %s402_s29 = scalar_lea.hbm %s875_s5, %s515_s16  ;;  %s260_s10 = scalar_lea.vmem [#allocation5], %s499_s27 }
  0x23   : > { %v326_v14 = vld [vmem:[%s873_s3] sm:$0xf]  ;;  %s404_s28 = sshll.u32 %s260_s10, 4  ;;  %s406_s9 = sshll.u32 %s402_s29, 4  ;;  %s405_s28 = int_to_ptr.vmem [resolvable:$true] %s404_s28  ;;  %s407_s9 = int_to_ptr.hbm [resolvable:$true] %s406_s9 }
  0x24   : > { %s389_s21 = scalar_lea.sflag [#allocation4], %s799_s25  ;;  %s624_s11 = sshra.s32 %s407_s9, 4  ;;  %s625_s11 = int_to_ptr.hbm [resolvable:$true] %s624_s11 }
  0x25   : > { %s626_s12 = scalar_lea.hbm %s625_s11, 8  ;;  %s630_s27 = scalar_lea.hbm %s875_s5, 16 }
  0x26   : > { %p627_p4 = scmp.ne.s32.totalorder %s625_s11, %s626_s12  ;;  %p631_p7 = scmp.lt.s32.totalorder %s625_s11, %s875_s5 }
  0x27   : > { %p632_p8 = scmp.lt.s32.totalorder %s630_s27, %s626_s12 }
  0x28   : > { %v273_v5 = vld.sshfl [vmem:[#allocation1] sm:$0xff pattern:$0x75316420]  ;;  %v274_v6 = vld.sshfl [vmem:[#allocation1 + $0x8] sm:$0xff pattern:$0x75316420]  ;;  %p628_p5 = pnand %p627_p4, %p776_p9 }
  0x29   : > { %501 = vmatpush.msk.msra.mxu0 %vm279_vm0, %v273_v5  ;;  %503 = vmatpush.msk.msra.mxu1 %vm279_vm0, %v274_v6  ;;  %p633_p10 = por %p632_p8, %p631_p7 }
  0x2a   : > { %502 = vmatmul.msk.f32.vlgmr.msra.gmra.mxu0 %vm275_vm1, %v264_v3  ;;  %504 = vmatmul.msk.f32.vlgmr.msra.gmra.mxu1 %vm275_vm1, %v264_v3  ;;  %p629_p6 = pneg %p628_p5 }
  0x2b   : > { %330 = vperm.xlu0 %579, %v327_v4  }
  0x2c   : > { %p634_p13 = pnand %p633_p10, %p629_p6 }
  0x94   : > { %v269_v7 = vpop.permute.xlu0 %268 }
  0x9d   : > { %v331_v15 = vpop.permute.xlu0 %330 }
  0xa7   : > { %v301_v8 = vpop.f32.mrf.mxu0  ;;  %v321_v9 = vpop.f32.mrf.mxu1 }
  0xa8   : > { %v302_v10 = vadd.f32 %v301_v8, %v269_v7  ;;  %v322_v11 = vadd.f32 %v321_v9, %v269_v7 }
  0xaa   : > { %v324_v12 = vmax.f32 %v302_v10, 0.0  ;;  %v325_v13 = vmax.f32 %v322_v11, 0.0 }
  0xac   : > { %505 = vmatpush.msk.msra.mxu2 %vm279_vm0, %v324_v12  ;;  %507 = vmatpush.msk.msra.mxu3 %vm279_vm0, %v325_v13 }
  0xad   : > { %506 = vmatmul.msk.f32.vlgmr.msra.gmra.mxu2 %vm275_vm1, %v326_v14  ;;  %508 = vmatmul.msk.f32.vlgmr.msra.gmra.mxu3 %vm275_vm1, %v326_v14 }
 0x130   : > { %v359_v16 = vpop.f32.mrf.mxu2  ;;  %v379_v17 = vpop.f32.mrf.mxu3 }
 0x131   : > { %v380_v18 = vadd.f32 %v379_v17, %v331_v15  ;;  %v360_v19 = vadd.f32 %v359_v16, %v331_v15 }
 0x133   : > { %v384_v20 = vrot.slane %v380_v18, 4 }
 0x135   : > { %v385_v21 = vsel %vm279_vm0, %v360_v19, %v384_v20 }
 0x136   : > { %387 = vst [vmem:[%s260_s10] sm:$0xff] %v385_v21 }
 0x137   : > { %637 = shalt.err (!%p634_p13)
}
 0x138   : > { %518 = dma.vmem_to_hbm [thread:$0]  (%p776_p9), %s405_s28, 128, %s407_s9, %s389_s21  }
 0x139 PF: > { %s418_s25 = sand.u32 1, %s672_s18   ;;  %p525_p0 = pnand %p494_p12, %p783_p11 }
 0x13a   : > { %s419_s16 = scalar_lea.sflag [#allocation4], %s418_s25 }
 0x13b   : > { %p526_p1 = pneg %p525_p0 }
 0x13d   : > { %667 = dma.done.wait (%p526_p1), %s419_s16, 128  }
 0x13e   : > { %669 = vsyncadd (%p526_p1), %s419_s16, 4294967168  ;;  %s21_s23 = sadd.s32 1, %s692_s23   ;;  %s880_s18 = smov %s676_s19 }
 0x13f   : > { %p18_p2 = scmp.ge.s32.totalorder %s21_s23, 4   ;;  %s881_s19 = smov %s680_s20 }
 0x140   : > { %s882_s20 = smov %s781_s7  ;;  %s883_s21 = smov %s688_s22 }
 0x141   : > { %s884_s22 = smov %s886_s26  ;;  %20 = sbr.rel (!%p18_p2) target bundleno = 6 (0x6), region = 85 }
 0x146   :  { %425 = vsyncpa [#allocation3], 1 }
 0x147   :  { %427 = vsyncpa [#allocation3 + $0x1], 1 }
 0x148   :  { %428 = vsyncpa [#allocation4], 1 }
 0x149   :  { %430 = vsyncpa [#allocation4 + $0x1], 1 }

</bundles_post_ra>
